<compile_context>
chip_gen: v5e
topology: v5e:2x2
jax: 0.10.0
libtpu: 0.0.40
codegen_flags: <defaults>
</compile_context>

<pallas_src>
import functools

import jax
import jax.numpy as jnp
from jax.experimental import pallas as pl
from jax.experimental.pallas import tpu as pltpu


def _layernorm_kernel(x_ref, gamma_ref, beta_ref, o_ref, *, eps, d_model):
    # x_ref: (row_tile, d_block); gamma/beta: (1, d_block).
    # Any padded lanes are zero-filled in HBM, so the one-pass statistics need
    # no masks and the padded output lanes come out as exactly 0 (gamma/beta
    # are zero-padded too); they are sliced off in the wrapper.
    x = x_ref[...]
    xf = x.astype(jnp.float32)

    inv_n = 1.0 / float(d_model)
    # torch.std defaults to the unbiased estimator (ddof=1).
    # TODO(synk): d_model == 1 gives var=0 (finite output) whereas torch.std
    # with ddof=1 would produce NaN; accepted semantic divergence.
    inv_nm1 = 1.0 / float(d_model - 1) if d_model > 1 else 1.0

    # Two cross-lane reductions per tile; no full-width temp is kept alive
    # across them (the output path re-reads x from the resident VMEM block).
    sum_x = jnp.sum(xf, axis=-1, keepdims=True)                 # (rows, 1)
    sum_xx = jnp.sum(xf * xf, axis=-1, keepdims=True)           # (rows, 1)
    mean = sum_x * inv_n
    # sum((x-mean)^2) == sum(x^2) - sum(x)*mean ; clamp against f32 rounding.
    var = jnp.maximum((sum_xx - sum_x * mean) * inv_nm1, 0.0)
    # Exact per-row reciprocal: (rows, 1) elements -> EUP cost is negligible.
    inv = pl.reciprocal(jnp.sqrt(var) + eps, approx=False)

    if x.dtype == jnp.bfloat16:
        # bf16-native elementwise path (v6e/v7x VPU); only stats stay in f32.
        out = ((x - mean.astype(x.dtype)) * inv.astype(x.dtype)
               * gamma_ref[...].astype(x.dtype)
               + beta_ref[...].astype(x.dtype))
    else:
        out = ((xf - mean) * inv * gamma_ref[...].astype(jnp.float32)
               + beta_ref[...].astype(jnp.float32))
    o_ref[...] = out.astype(o_ref.dtype)


def _round_up(v, m):
    return ((v + m - 1) // m) * m


def layer_norm(x, gamma, beta, eps=1e-6):
    """x: (..., d_model); gamma, beta: (d_model,)."""
    orig_shape = x.shape
    d_model = orig_shape[-1]
    rows = 1
    for s in orig_shape[:-1]:
        rows *= s
    rows = max(rows, 1)

    dtype_bytes = jnp.dtype(x.dtype).itemsize
    # sublane packing: 8 rows for 4-byte, 16 for 2-byte, 32 for 1-byte dtypes
    sub = {4: 8, 2: 16, 1: 32}.get(dtype_bytes, 8)

    x2 = x.reshape(rows, d_model)

    if d_model >= 128:
        # Block's last dim equals the full array dim -> legal for any d_model,
        # Mosaic masks the ragged tail lanes internally. No pad/slice passes.
        d_block = d_model
        pad_lanes = 0
        gamma2 = gamma.reshape(1, d_model)
        beta2 = beta.reshape(1, d_model)
    else:
        # Very narrow feature dim: pad to one full lane group (128) so the
        # store path is lane-dense. Zero padding keeps the one-pass stats and
        # the padded output lanes exact (they come out as 0 and are sliced).
        d_block = 128
        pad_lanes = d_block - d_model
        x2 = jnp.pad(x2, ((0, 0), (0, pad_lanes)))
        gamma2 = jnp.pad(gamma, (0, pad_lanes)).reshape(1, d_block)
        beta2 = jnp.pad(beta, (0, pad_lanes)).reshape(1, d_block)

    # --- block sizing: budget by bytes, not rows ---------------------------
    try:
        vmem_cap = int(pltpu.get_tpu_info().vmem_capacity_bytes)
    except Exception:
        vmem_cap = 64 * 1024 * 1024
    # Scoped limit: half of physical VMEM, clamped to [16 MiB, 64 MiB].
    vmem_limit = max(16 * 1024 * 1024, min(vmem_cap // 2, 64 * 1024 * 1024))
    # Real footprint ~= in(x2 double-buffered) + out(x2) + f32 intermediates
    # ~= 6 blocks; cap a single block at 8 MiB.
    block_budget = min(8 * 1024 * 1024, max(512 * 1024, vmem_limit // 6))

    row_tile = (block_budget // (d_block * dtype_bytes)) // sub * sub
    row_tile = max(sub, row_tile)
    # Keep enough grid steps so both v7x TensorCores get balanced work.
    target_steps = 8
    tile_for_steps = max(sub, _round_up(pl.cdiv(rows, target_steps), sub))
    row_tile = min(row_tile, tile_for_steps)

    # No row padding: partial last block is handled by Pallas (writes clipped).
    grid = (pl.cdiv(rows, row_tile),)

    kernel = functools.partial(_layernorm_kernel, eps=eps, d_model=d_model)

    out = pl.pallas_call(
        kernel,
        out_shape=jax.ShapeDtypeStruct((rows, d_block), x.dtype),
        grid_spec=pltpu.PrefetchScalarGridSpec(
            num_scalar_prefetch=0,
            grid=grid,
            in_specs=[
                pl.BlockSpec((row_tile, d_block), lambda i: (i, 0)),
                pl.BlockSpec((1, d_block), lambda i: (0, 0)),
                pl.BlockSpec((1, d_block), lambda i: (0, 0)),
            ],
            out_specs=pl.BlockSpec((row_tile, d_block), lambda i: (i, 0)),
        ),
        compiler_params=pltpu.CompilerParams(
            dimension_semantics=("parallel",),
            vmem_limit_bytes=vmem_limit,
        ),
    )(x2, gamma2, beta2)

    if pad_lanes:
        out = out[:, :d_model]
    return out.reshape(orig_shape)


if __name__ == "__main__":
    d_model = 32
    batch, seq = 2, 8

    key = jax.random.PRNGKey(0)
    x = jax.random.normal(key, (batch, seq, d_model), dtype=jnp.float32)

    # Deterministic parameter init (matches nn.Parameter(torch.ones/zeros)).
    gamma = jnp.ones((d_model,), dtype=jnp.float32)
    beta = jnp.zeros((d_model,), dtype=jnp.float32)

    out = layer_norm(x, gamma, beta, eps=1e-6)
    out = jax.block_until_ready(out)

    # Reference check in plain JAX (same unbiased-std formula as torch.std).
    mean = jnp.mean(x, axis=-1, keepdims=True)
    var = jnp.sum((x - mean) ** 2, axis=-1, keepdims=True) / (d_model - 1)
    ref = gamma * (x - mean) / (jnp.sqrt(var) + 1e-6) + beta
    assert jnp.allclose(out, ref, atol=1e-4, rtol=1e-4), "mismatch vs reference"

    print("KERNEL_OK")
</pallas_src>

<mosaic_0001>
module attributes {stable_mosaic.version = 11 : i64} {
  func.func @_layernorm_kernel(%arg0: i32, %arg1: memref<8x128xf32, #tpu.memory_space<vmem>>, %arg2: memref<1x128xf32, #tpu.memory_space<vmem>>, %arg3: memref<1x128xf32, #tpu.memory_space<vmem>>, %arg4: memref<8x128xf32, #tpu.memory_space<vmem>>) attributes {dimension_semantics = [#tpu.dimension_semantics<parallel>], iteration_bounds = array<i64: 2>, scalar_prefetch = 0 : i64, scratch_operands = 0 : i64, tpu.core_type = #tpu.core_type<tc>, window_params = [{transform_indices = @transform_0, window_bounds = array<i64: 8, 128>}, {pipeline_mode = #tpu.pipeline_mode<synchronous>, transform_indices = @transform_1, window_bounds = array<i64: 1, 128>}, {pipeline_mode = #tpu.pipeline_mode<synchronous>, transform_indices = @transform_2, window_bounds = array<i64: 1, 128>}, {transform_indices = @transform_3, window_bounds = array<i64: 8, 128>}]} {
    %c0 = arith.constant 0 : index
    %c0_0 = arith.constant 0 : index
    %0 = vector.load %arg1[%c0, %c0_0] : memref<8x128xf32, #tpu.memory_space<vmem>>, vector<8x128xf32>
    %cst = arith.constant dense<0.000000e+00> : vector<8xf32>
    %1 = vector.multi_reduction <add>, %0, %cst [1] : vector<8x128xf32> to vector<8xf32>
    %2 = vector.shape_cast %1 : vector<8xf32> to vector<8x1xf32>
    %3 = arith.mulf %0, %0 : vector<8x128xf32>
    %cst_1 = arith.constant dense<0.000000e+00> : vector<8xf32>
    %4 = vector.multi_reduction <add>, %3, %cst_1 [1] : vector<8x128xf32> to vector<8xf32>
    %5 = vector.shape_cast %4 : vector<8xf32> to vector<8x1xf32>
    %cst_2 = arith.constant 3.125000e-02 : f32
    %6 = vector.broadcast %cst_2 : f32 to vector<8x1xf32>
    %7 = arith.mulf %2, %6 : vector<8x1xf32>
    %8 = arith.mulf %2, %7 : vector<8x1xf32>
    %9 = arith.subf %5, %8 : vector<8x1xf32>
    %cst_3 = arith.constant 0.0322580636 : f32
    %10 = vector.broadcast %cst_3 : f32 to vector<8x1xf32>
    %11 = arith.mulf %9, %10 : vector<8x1xf32>
    %cst_4 = arith.constant 0.000000e+00 : f32
    %12 = vector.broadcast %cst_4 : f32 to vector<8x1xf32>
    %13 = arith.maximumf %11, %12 : vector<8x1xf32>
    %14 = math.sqrt %13 : vector<8x1xf32>
    %cst_5 = arith.constant 9.99999997E-7 : f32
    %15 = vector.broadcast %cst_5 : f32 to vector<8x1xf32>
    %16 = arith.addf %14, %15 : vector<8x1xf32>
    %17 = tpu.reciprocal %16 : vector<8x1xf32> -> vector<8x1xf32>
    %18 = vector.broadcast %7 : vector<8x1xf32> to vector<8x128xf32>
    %19 = arith.subf %0, %18 : vector<8x128xf32>
    %20 = vector.broadcast %17 : vector<8x1xf32> to vector<8x128xf32>
    %21 = arith.mulf %19, %20 : vector<8x128xf32>
    %c0_6 = arith.constant 0 : index
    %c0_7 = arith.constant 0 : index
    %22 = vector.load %arg2[%c0_6, %c0_7] : memref<1x128xf32, #tpu.memory_space<vmem>>, vector<1x128xf32>
    %23 = vector.broadcast %22 : vector<1x128xf32> to vector<8x128xf32>
    %24 = arith.mulf %21, %23 : vector<8x128xf32>
    %c0_8 = arith.constant 0 : index
    %c0_9 = arith.constant 0 : index
    %25 = vector.load %arg3[%c0_8, %c0_9] : memref<1x128xf32, #tpu.memory_space<vmem>>, vector<1x128xf32>
    %26 = vector.broadcast %25 : vector<1x128xf32> to vector<8x128xf32>
    %27 = arith.addf %24, %26 : vector<8x128xf32>
    %c0_10 = arith.constant 0 : index
    %c0_11 = arith.constant 0 : index
    %28 = vector.load %arg4[%c0_10, %c0_11] : memref<8x128xf32, #tpu.memory_space<vmem>>, vector<8x128xf32>
    tpu.vector_store %arg4[%c0_10, %c0_11], %27 {strides = array<i32>} : memref<8x128xf32, #tpu.memory_space<vmem>>, vector<8x128xf32>,
    return
  }
  func.func @transform_0(%arg0: i32) -> (i32, i32) {
    %c0_i32 = arith.constant 0 : i32
    %c0_i32_0 = arith.constant 0 : i32
    return %arg0, %c0_i32 : i32, i32
  }
  func.func @transform_1(%arg0: i32) -> (i32, i32) {
    %c0_i32 = arith.constant 0 : i32
    %c0_i32_0 = arith.constant 0 : i32
    %c0_i32_1 = arith.constant 0 : i32
    return %c0_i32, %c0_i32_0 : i32, i32
  }
  func.func @transform_2(%arg0: i32) -> (i32, i32) {
    %c0_i32 = arith.constant 0 : i32
    %c0_i32_0 = arith.constant 0 : i32
    %c0_i32_1 = arith.constant 0 : i32
    return %c0_i32, %c0_i32_0 : i32, i32
  }
  func.func @transform_3(%arg0: i32) -> (i32, i32) {
    %c0_i32 = arith.constant 0 : i32
    %c0_i32_0 = arith.constant 0 : i32
    return %arg0, %c0_i32 : i32, i32
  }
}

</mosaic_0001>

<bundles_post_ra>
// kernel: tpu_custom_call.1
= control target key start
LH: loop header
LB: loop body
LE: loop exit
PB: predicated region body
PF: predicated region fallthrough
CT: control target
= control target key end

     0   :  { %8 = vsyncpa [#allocation3], 0  ;;  %s725_s0 = inlined_call_operand.hbm [shape: f32[16,128], index: 0, kind: input, shape index: {}]   ;;  %s726_s1 = inlined_call_operand.hbm [shape: f32[1,128], index: 1, kind: input, shape index: {}]   ;;  %s727_s2 = inlined_call_operand.vmem [shape: f32[1,128], index: 2, kind: input, shape index: {}]   ;;  %s728_s3 = inlined_call_operand.hbm [shape: f32[16,128], index: 3, kind: output, shape index: {}]  }
   0x1   :  { %10 = vsyncpa [#allocation3 + $0x1], 0 }
   0x2   :  { %11 = vsyncpa [#allocation6], 0 }
   0x3   :  { %12 = vsyncpa [#allocation4], 0 }
   0x4   :  { %14 = vsyncpa [#allocation4 + $0x1], 0  ;;  %s580_s12 = smov 0   ;;  %s582_s13 = smov 0  }
   0x5   :  { %s584_s14 = smov 0   ;;  %s586_s15 = smov 0  }
   0x6 LB: > { %s601_s16 = sadd.s32 4294967295, %s557_s15   ;;  %s350_s17 = sadd.s32 4294967294, %s557_s15   ;;  %s557_s15 = sphi %s586_s15, %s738_s15   ;;  %s553_s14 = sphi %s584_s14, %s737_s14   ;;  %s549_s13 = sphi %s582_s13, %s736_s13   ;;  %s545_s12 = sphi %s580_s12, %s735_s12  }
   0x7   : > { %p40_p0 = scmp.ne.s32.totalorder %s549_s13, %s545_s12  ;;  %p41_p1 = scmp.eq.s32.totalorder %s601_s16, 0 }
   0x8   : > { %p106_p2 = scmp.eq.s32.totalorder %s601_s16, 1  ;;  %p112_p3 = scmp.eq.s32.totalorder %s350_s17, 1 }
   0x9   : > { %p610_p4 = por %p41_p1, %p40_p0  ;;  %p351_p5 = scmp.ge.s32.totalorder %s557_s15, 1 }
   0xa   : > { %p615_p6 = por %p112_p3, %p40_p0  ;;  %p119_p7 = scmp.lt.s32.totalorder %s557_s15, 3 }
   0xb   : > { %s131_s22 = sshll.u32 %s726_s1, 4  ;;  %s559_s24 = smov [#allocation5]   ;;  %s132_s22 = int_to_ptr.hbm [resolvable:$true] %s131_s22 }
   0xc   : > { %p623_p8 = pnand %p351_p5, %p119_p7  ;;  %s133_s25 = sshll.u32 %s559_s24, 4  ;;  %s134_s25 = int_to_ptr.vmem [resolvable:$true] %s133_s25 }
   0xd   : > { %s633_s26 = sadd.s32 1, %s557_s15   ;;  %s27_s27 = sadd.s32 1, %s553_s14 }
   0xe   : > { %p372_p10 = pneg %p623_p8  ;;  %s24_s28 = ssub.s32 %s557_s15, %s633_s26 }
   0xf   : > { %p25_p12 = scmp.eq.s32.totalorder %s24_s28, 0  ;;  %p34_p13 = scmp.ne.s32.totalorder %s553_s14, %s549_s13 }
  0x10   : > { %p373_p11 = pnand %p372_p10, %p41_p1  ;;  %p35_p0 = scmp.eq.s32.totalorder %s557_s15, 0 }
  0x11   : > { %s642_s29 = scalar_select %p25_p12, %s553_s14, %s27_s27  }
  0x12   : > { %375 = dma.hbm_to_vmem [thread:$0]  (!%p373_p11), %s132_s22, 16, %s134_s25, [#allocation6]  }
  0x13   : > { %p646_p3 = por %p106_p2, %p34_p13  ;;  %p385_p5 = scmp.lt.s32.totalorder %s557_s15, 2 }
  0x14   : > { %s147_s4 = sand.u32 1, %s553_s14   ;;  %s355_s5 = sshll.u32 %s557_s15, 3 }
  0x15   : > { %p36_p7 = por %p35_p0, %p34_p13  ;;  %s354_s6 = sshll.u32 %s147_s4, 3 }
  0x16   : > { %s155_s9 = scalar_lea.hbm %s725_s0, %s355_s5  ;;  %s151_s11 = scalar_lea.vmem [#allocation2], %s354_s6 }
  0x17   : > { %s157_s10 = sshll.u32 %s155_s9, 4  ;;  %s159_s17 = sshll.u32 %s151_s11, 4  ;;  %s158_s10 = int_to_ptr.hbm [resolvable:$true] %s157_s10  ;;  %s160_s17 = int_to_ptr.vmem [resolvable:$true] %s159_s17 }
  0x18   : > { %p656_p10 = pnand %p385_p5, %p36_p7  ;;  %s148_s21 = scalar_lea.sflag [#allocation3], %s147_s4 }
  0x19   : > { %s457_s22 = sshra.s32 %s158_s10, 4  ;;  %s464_s28 = scalar_lea.hbm %s725_s0, 16  ;;  %s458_s22 = int_to_ptr.hbm [resolvable:$true] %s457_s22 }
  0x1a   : > { %s459_s24 = scalar_lea.hbm %s458_s22, 8  ;;  %p461_p11 = pneg %p656_p10 }
  0x1b   : > { %p460_p2 = scmp.ne.s32.totalorder %s458_s22, %s459_s24  ;;  %p465_p0 = scmp.lt.s32.totalorder %s458_s22, %s725_s0 }
  0x1c   : > { %p466_p5 = scmp.lt.s32.totalorder %s464_s28, %s459_s24 }
  0x1d   : > { %p462_p12 = pnand %p461_p11, %p460_p2 }
  0x1e   : > { %p467_p7 = por %p466_p5, %p465_p0 }
  0x1f   : > { %p463_p13 = pneg %p462_p12 }
  0x21   : > { %p468_p9 = pnand %p467_p7, %p463_p13 }
  0x23   : > { %471 = shalt.err (!%p468_p9)
}
  0x24   : > { %379 = dma.hbm_to_vmem [thread:$0]  (!%p656_p10), %s158_s10, 128, %s160_s17, %s148_s21  }
  0x25   : > { %168 = sbr.rel (%p623_p8) target bundleno = 225 (0xe1), region = 32  ;;  %s673_s4 = sand.u32 (!%p623_p8), 1, %s549_s13  }
  0x26   : > { %s357_s7 = sshll.u32 (!%p623_p8), %s673_s4, 3  ;;  %s171_s8 = scalar_lea.sflag (!%p623_p8), [#allocation3], %s673_s4 }
  0x27   : > { %s174_s9 = scalar_lea.vmem (!%p623_p8), [#allocation2], %s357_s7 }
  0x2a   : > { %532 = dma.done.wait (%p610_p4), %s171_s8, 128  }
  0x2b   : > { %534 = vsyncadd (%p610_p4), %s171_s8, 4294967168 }
  0x2c   : > { %536 = dma.done.wait (%p41_p1), [#allocation6], 16  }
  0x2d   : > { %538 = vsyncadd (%p41_p1), [#allocation6], 4294967280  ;;  %v203_v0 = vld [vmem:[%s174_s9] sm:$0xff]  ;;  %s361_s18 = sshll.u32 %s601_s16, 3  ;;  %v421_v30 = vld [vmem:[#allocation5] ss:$0 sm:$0xff] }
  0x2e   : > { %204 = vadd.xlane.f32.xlu0 %v203_v0  ;;  %v206_v1 = vmul.f32 %v203_v0, %v203_v0  ;;  %s265_s11 = scalar_lea.hbm %s728_s3, %s361_s18  ;;  %v422_v33 = vld [vmem:[%s727_s2] ss:$0 sm:$0xff]  ;;  %s202_s16 = scalar_lea.vmem [#allocation7], %s357_s7 }
  0x2f   : > { %s267_s21 = sshll.u32 %s202_s16, 4  ;;  %s269_s22 = sshll.u32 %s265_s11, 4  ;;  %s268_s21 = int_to_ptr.vmem [resolvable:$true] %s267_s21  ;;  %s270_s22 = int_to_ptr.hbm [resolvable:$true] %s269_s22 }
  0x30   : > { %s255_s24 = scalar_lea.sflag [#allocation4], %s673_s4  ;;  %s501_s25 = sshra.s32 %s270_s22, 4  ;;  %s502_s25 = int_to_ptr.hbm [resolvable:$true] %s501_s25 }
  0x31   : > { %s503_s27 = scalar_lea.hbm %s502_s25, 8  ;;  %s507_s6 = scalar_lea.hbm %s728_s3, 16 }
  0x32   : > { %p504_p1 = scmp.ne.s32.totalorder %s502_s25, %s503_s27  ;;  %p508_p9 = scmp.lt.s32.totalorder %s502_s25, %s728_s3 }
  0x33   : > { %p509_p10 = scmp.lt.s32.totalorder %s507_s6, %s503_s27 }
  0x34   : > { %p505_p4 = pnand %p504_p1, %p646_p3 }
  0x35   : > { %p510_p2 = por %p509_p10, %p508_p9 }
  0x36   : > { %207 = vadd.xlane.f32.xlu0 %v206_v1  ;;  %p506_p8 = pneg %p505_p4 }
  0x38   : > { %p511_p11 = pnand %p510_p2, %p506_p8 }
  0xa1   : > { %v205_v2 = vpop.xlane.xlu0 %204 }
  0xa2   : > { %v209_v3 = vmul.f32 0.03125, %v205_v2 }
  0xa4   : > { %v210_v4 = vmul.f32 %v209_v3, %v205_v2  ;;  %v241_v28 = vsub.f32 %v203_v0, %v209_v3 }
  0xa9   : > { %v208_v5 = vpop.xlane.xlu0 %207 }
  0xaa   : > { %v211_v6 = vsub.f32 %v208_v5, %v210_v4 }
  0xac   : > { %v212_v7 = vmul.f32 0.032258064, %v211_v6 }
  0xae   : > { %v213_v8 = vmax.f32 %v212_v7, 0.0 }
  0xb0   : > { %423 = vrsqrt.f32 %v213_v8  ;;  %vm221_vm0 = vcmp.eq.f32.partialorder %v213_v8, inf  ;;  %v224_v16 = vand.u32 2147483648, %v213_v8  ;;  %vm223_vm1 = vcmp.eq.f32.partialorder %v213_v8, 0.0 }
  0xb6   : > { %v424_v9 = vpop.eup %423 }
  0xb7   : > { %v215_v10 = vmul.f32 %v424_v9, %v213_v8 }
  0xb9   : > { %v216_v11 = vmul.f32 %v424_v9, %v215_v10 }
  0xbb   : > { %v217_v12 = vmul.f32 0.5, %v216_v11 }
  0xbd   : > { %v218_v13 = vsub.f32 1.5, %v217_v12 }
  0xbf   : > { %v219_v14 = vmul.f32 %v424_v9, %v218_v13 }
  0xc1   : > { %v220_v15 = vmul.f32 %v219_v14, %v213_v8 }
  0xc3   : > { %v222_v17 = vsel %vm221_vm0, %v213_v8, %v220_v15 }
  0xc4   : > { %v225_v18 = vsel %vm223_vm1, %v224_v16, %v222_v17 }
  0xc5   : > { %v226_v19 = vadd.f32 1e-06, %v225_v18 }
  0xc7   : > { %425 = vrcp.f32 %v226_v19  ;;  %v238_v23 = vand.u32 2147483648, %v226_v19  ;;  %v236_v25 = vand.u32 2147483647, %v226_v19  ;;  %vm232_vm3 = vweird.f32 %v226_v19 }
  0xc9   : > { %v239_v27 = vor.u32 1.1754944e-38, %v238_v23  ;;  %vm237_vm5 = vcmp.eq.f32.partialorder %v236_v25, 8.507059e+37 }
  0xcd   : > { %v426_v20 = vpop.eup %425 }
  0xce   : > { %v228_v21 = vmul.f32 %v426_v20, %v226_v19  ;;  %vm233_vm2 = vweird.f32 %v426_v20 }
  0xcf   : > { %vm234_vm4 = vmor %vm232_vm3, %vm233_vm2 }
  0xd0   : > { %v229_v22 = vsub.f32 1.0, %v228_v21 }
  0xd2   : > { %v230_v24 = vmul.f32 %v426_v20, %v229_v22 }
  0xd4   : > { %v231_v26 = vadd.f32 %v426_v20, %v230_v24 }
  0xd6   : > { %v235_v29 = vsel %vm234_vm4, %v426_v20, %v231_v26 }
  0xd7   : > { %v240_v31 = vsel %vm237_vm5, %v239_v27, %v235_v29 }
  0xd8   : > { %v242_v32 = vmul.f32 %v241_v28, %v240_v31 }
  0xda   : > { %v247_v34 = vmul.f32 %v421_v30, %v242_v32 }
  0xdc   : > { %v252_v35 = vadd.f32 %v422_v33, %v247_v34 }
  0xde   : > { %253 = vst [vmem:[%s202_s16] sm:$0xff] %v252_v35 }
  0xdf   : > { %514 = shalt.err (!%p511_p11)
}
  0xe0   : > { %370 = dma.vmem_to_hbm [thread:$0]  (%p646_p3), %s268_s21, 128, %s270_s22, %s255_s24  }
  0xe1 PF: > { %s281_s4 = sand.u32 1, %s545_s12   ;;  %p734_p12 = scmp.ge.s32.totalorder %s557_s15, 2 }
  0xe2   : > { %s282_s9 = scalar_lea.sflag [#allocation4], %s281_s4 }
  0xe3   : > { %p381_p13 = pnand %p734_p12, %p615_p6 }
  0xe5   : > { %p382_p0 = pneg %p381_p13 }
  0xe7   : > { %540 = dma.done.wait (%p382_p0), %s282_s9, 128  }
  0xe8   : > { %542 = vsyncadd (%p382_p0), %s282_s9, 4294967168  ;;  %p17_p5 = scmp.ge.s32.totalorder %s633_s26, 4   ;;  %s735_s12 = smov %s549_s13 }
  0xe9   : > { %s736_s13 = smov %s553_s14  ;;  %s737_s14 = smov %s642_s29 }
  0xea   : > { %s738_s15 = smov %s633_s26  ;;  %19 = sbr.rel (!%p17_p5) target bundleno = 6 (0x6), region = 81 }
  0xef   :  { %288 = vsyncpa [#allocation3], 1 }
  0xf0   :  { %290 = vsyncpa [#allocation3 + $0x1], 1 }
  0xf1   :  { %291 = vsyncpa [#allocation6], 1 }
  0xf2   :  { %292 = vsyncpa [#allocation4], 1 }
  0xf3   :  { %294 = vsyncpa [#allocation4 + $0x1], 1 }

</bundles_post_ra>
